<compile_context>
chip_gen: v5e
topology: v5e:2x2
jax: 0.10.0
libtpu: 0.0.40
codegen_flags: <defaults>
</compile_context>

<pallas_src>
import numpy as np
import jax
import jax.numpy as jnp
from jax.experimental import pallas as pl
from jax.experimental.pallas import tpu as pltpu


# ----------------------------------------------------------------------------
# Fast |cos|:  |cos(d)| has period pi and is symmetric about pi/2 on [0, pi]:
#     m = d mod pi           in [0, pi)
#     u = pi/2 - |m - pi/2|  in [0, pi/2]
#     |cos(d)| = cos(u)
# cos(u) on [0, pi/2] via even-degree-12 polynomial (abs err < 7e-9, below
# f32 rounding).  Avoids the generic XLA cos expansion's quadrant bookkeeping.
# ----------------------------------------------------------------------------
_PI_HI = np.float32(3.140625)                  # two-term Cody-Waite split of pi
_PI_LO = np.float32(np.pi - 3.140625)
_INV_PI = np.float32(1.0 / np.pi)
_HALF_PI = np.float32(np.pi / 2.0)
_COS_COEFFS = (                                # cos(u) = 1 + u^2*(C1 + u^2*(...))
    np.float32(-1.0 / 2.0),
    np.float32(1.0 / 24.0),
    np.float32(-1.0 / 720.0),
    np.float32(1.0 / 40320.0),
    np.float32(-1.0 / 3628800.0),
    np.float32(1.0 / 479001600.0),
)


def _abs_cos(d):
    q = jnp.floor(d * _INV_PI)
    m = (d - q * _PI_HI) - q * _PI_LO          # d mod pi, in [0, pi)
    u = _HALF_PI - jnp.abs(m - _HALF_PI)       # fold to [0, pi/2]
    u2 = u * u
    p = _COS_COEFFS[-1]
    for c in reversed(_COS_COEFFS[:-1]):
        p = p * u2 + c
    return 1.0 + u2 * p                        # |cos(d)|


def _cycl_loss_y_kernel(s_ref, x_ref, o_ref):
    # s_ref: SMEM f32[2] = (target, r);  x_ref/o_ref: (tile_rows, lanes) block.
    t = s_ref[0]
    r = s_ref[1]
    x = x_ref[...].astype(jnp.float32)
    # -r * (1 - |cos(x - t)|)  ==  r * |cos(x - t)| - r
    o_ref[...] = (r * _abs_cos(x - t) - r).astype(o_ref.dtype)


# ----------------------------------------------------------------------------
# Layout selection (no padding): n_elems is a positive multiple of 128.
# ----------------------------------------------------------------------------
_BLOCK_BYTES = 4 * 1024 * 1024                 # ~4 MiB input block


def _sublane_multiple(dtype):
    return {4: 8, 2: 16, 1: 32}.get(jnp.dtype(dtype).itemsize, 8)


def _choose_layout(n_elems, itemsize, sub):
    lanes = 128
    for cand in (1024, 512, 256):
        if n_elems % cand == 0:
            lanes = cand
            break
    rows = n_elems // lanes
    budget_rows = max(sub, (_BLOCK_BYTES // (lanes * itemsize)) // sub * sub)
    if rows <= budget_rows:
        # Split a clean single block in two so v7x's second TensorCore has work.
        if rows >= 2 * sub and rows % (2 * sub) == 0:
            return lanes, rows, rows // 2
        return lanes, rows, rows               # block dim == full dim (legal)
    # Largest sublane-multiple tile <= budget that divides rows exactly.
    tile = budget_rows
    while tile >= sub:
        if rows % tile == 0:
            return lanes, rows, tile
        tile -= sub
    # No exact divisor: ragged last block; Pallas masks the out-of-range rows.
    return lanes, rows, budget_rows


def cycl_loss_y(output: jax.Array, target, r=1.0) -> jax.Array:
    """output: arbitrary shape; target: broadcast scalar (any 1-element array); r scalar."""
    orig_shape = output.shape
    out_dtype = output.dtype
    total = int(np.prod(orig_shape)) if orig_shape else 1

    t_scalar = jnp.asarray(target, jnp.float32).reshape(-1)[0]
    r_scalar = jnp.asarray(r, jnp.float32).reshape(-1)[0]

    flat = output.reshape(-1)
    main = (total // 128) * 128
    tail = total - main

    if main == 0:
        # <128 elements: not worth a kernel launch; same math in plain jnp.
        res = r_scalar * jnp.abs(jnp.cos(flat.astype(jnp.float32) - t_scalar)) - r_scalar
        return res.astype(out_dtype).reshape(orig_shape)

    itemsize = jnp.dtype(out_dtype).itemsize
    sub = _sublane_multiple(out_dtype)
    lanes, rows, tile_rows = _choose_layout(main, itemsize, sub)

    x_main = flat if tail == 0 else flat[:main]
    x2d = x_main.reshape(rows, lanes)          # lane-dense slab, input dtype kept
    scalars = jnp.stack([t_scalar, r_scalar])  # SMEM f32[2]

    grid = (pl.cdiv(rows, tile_rows),)

    out2d = pl.pallas_call(
        _cycl_loss_y_kernel,
        out_shape=jax.ShapeDtypeStruct((rows, lanes), out_dtype),
        grid_spec=pl.GridSpec(
            grid=grid,
            in_specs=[
                pl.BlockSpec(memory_space=pltpu.SMEM),               # (target, r)
                pl.BlockSpec((tile_rows, lanes), lambda i: (i, 0)),  # input row tile
            ],
            out_specs=pl.BlockSpec((tile_rows, lanes), lambda i: (i, 0)),
        ),
        compiler_params=pltpu.CompilerParams(
            dimension_semantics=("parallel",),     # shard row tiles across v7x TCs
            vmem_limit_bytes=32 * 1024 * 1024,     # 4 MiB blocks x (in+out) x 2 bufs
        ),
    )(scalars, x2d)

    out_flat = out2d.reshape(-1)
    if tail:
        x_tail = flat[main:].astype(jnp.float32)
        out_tail = (r_scalar * jnp.abs(jnp.cos(x_tail - t_scalar)) - r_scalar).astype(out_dtype)
        out_flat = jnp.concatenate([out_flat, out_tail])
    return out_flat.reshape(orig_shape)


if __name__ == "__main__":
    r = 1.0
    key = jax.random.PRNGKey(0)

    # "output" tensor (NCHW-style small shape); target = linspace(pi, pi, 1).view(-1, 1)
    x = jax.random.normal(key, (2, 4, 16, 16), dtype=jnp.float32)
    target = jnp.full((1, 1), np.pi, dtype=jnp.float32)

    y = jax.block_until_ready(cycl_loss_y(x, target, r=r))

    # Reference check (same math as the PyTorch module).
    ref = -r * (1.0 - jnp.abs(jnp.cos(x - target.reshape(()))))
    assert y.shape == x.shape and y.dtype == x.dtype
    np.testing.assert_allclose(np.asarray(y), np.asarray(ref), rtol=1e-5, atol=1e-5)

    print("KERNEL_OK")
</pallas_src>

<mosaic_0001>
module attributes {stable_mosaic.version = 11 : i64} {
  func.func @_cycl_loss_y_kernel(%arg0: i32, %arg1: memref<2xf32, #tpu.memory_space<smem>>, %arg2: memref<2x1024xf32, #tpu.memory_space<vmem>>, %arg3: memref<2x1024xf32, #tpu.memory_space<vmem>>) attributes {dimension_semantics = [#tpu.dimension_semantics<parallel>], iteration_bounds = array<i64: 1>, scalar_prefetch = 0 : i64, scratch_operands = 0 : i64, tpu.core_type = #tpu.core_type<tc>, window_params = [{transform_indices = @transform_0, window_bounds = array<i64: 2>}, {transform_indices = @transform_1, window_bounds = array<i64: 2, 1024>}, {transform_indices = @transform_2, window_bounds = array<i64: 2, 1024>}]} {
    %c0 = arith.constant 0 : index
    %0 = memref.load %arg1[%c0] : memref<2xf32, #tpu.memory_space<smem>>
    %c1 = arith.constant 1 : index
    %1 = memref.load %arg1[%c1] : memref<2xf32, #tpu.memory_space<smem>>
    %c0_0 = arith.constant 0 : index
    %c0_1 = arith.constant 0 : index
    %2 = vector.load %arg2[%c0_0, %c0_1] : memref<2x1024xf32, #tpu.memory_space<vmem>>, vector<2x1024xf32>
    %3 = vector.broadcast %0 : f32 to vector<2x1024xf32>
    %4 = arith.subf %2, %3 : vector<2x1024xf32>
    %cst = arith.constant 0.318309873 : f32
    %5 = vector.broadcast %cst : f32 to vector<2x1024xf32>
    %6 = arith.mulf %4, %5 : vector<2x1024xf32>
    %7 = math.floor %6 : vector<2x1024xf32>
    %cst_2 = arith.constant 3.140625 : f32
    %8 = vector.broadcast %cst_2 : f32 to vector<2x1024xf32>
    %9 = arith.mulf %7, %8 : vector<2x1024xf32>
    %10 = arith.subf %4, %9 : vector<2x1024xf32>
    %cst_3 = arith.constant 9.67653584E-4 : f32
    %11 = vector.broadcast %cst_3 : f32 to vector<2x1024xf32>
    %12 = arith.mulf %7, %11 : vector<2x1024xf32>
    %13 = arith.subf %10, %12 : vector<2x1024xf32>
    %cst_4 = arith.constant 1.57079637 : f32
    %14 = vector.broadcast %cst_4 : f32 to vector<2x1024xf32>
    %15 = arith.subf %13, %14 : vector<2x1024xf32>
    %16 = math.absf %15 : vector<2x1024xf32>
    %cst_5 = arith.constant 1.57079637 : f32
    %17 = vector.broadcast %cst_5 : f32 to vector<2x1024xf32>
    %18 = arith.subf %17, %16 : vector<2x1024xf32>
    %19 = arith.mulf %18, %18 : vector<2x1024xf32>
    %cst_6 = arith.constant 2.08767559E-9 : f32
    %20 = vector.broadcast %cst_6 : f32 to vector<2x1024xf32>
    %21 = arith.mulf %20, %19 : vector<2x1024xf32>
    %cst_7 = arith.constant -2.755732E-7 : f32
    %22 = vector.broadcast %cst_7 : f32 to vector<2x1024xf32>
    %23 = arith.addf %21, %22 : vector<2x1024xf32>
    %24 = arith.mulf %23, %19 : vector<2x1024xf32>
    %cst_8 = arith.constant 2.48015876E-5 : f32
    %25 = vector.broadcast %cst_8 : f32 to vector<2x1024xf32>
    %26 = arith.addf %24, %25 : vector<2x1024xf32>
    %27 = arith.mulf %26, %19 : vector<2x1024xf32>
    %cst_9 = arith.constant -0.00138888892 : f32
    %28 = vector.broadcast %cst_9 : f32 to vector<2x1024xf32>
    %29 = arith.addf %27, %28 : vector<2x1024xf32>
    %30 = arith.mulf %29, %19 : vector<2x1024xf32>
    %cst_10 = arith.constant 0.0416666679 : f32
    %31 = vector.broadcast %cst_10 : f32 to vector<2x1024xf32>
    %32 = arith.addf %30, %31 : vector<2x1024xf32>
    %33 = arith.mulf %32, %19 : vector<2x1024xf32>
    %cst_11 = arith.constant -5.000000e-01 : f32
    %34 = vector.broadcast %cst_11 : f32 to vector<2x1024xf32>
    %35 = arith.addf %33, %34 : vector<2x1024xf32>
    %36 = arith.mulf %19, %35 : vector<2x1024xf32>
    %cst_12 = arith.constant 1.000000e+00 : f32
    %37 = vector.broadcast %cst_12 : f32 to vector<2x1024xf32>
    %38 = arith.addf %37, %36 : vector<2x1024xf32>
    %39 = vector.broadcast %1 : f32 to vector<2x1024xf32>
    %40 = arith.mulf %39, %38 : vector<2x1024xf32>
    %41 = vector.broadcast %1 : f32 to vector<2x1024xf32>
    %42 = arith.subf %40, %41 : vector<2x1024xf32>
    %c0_13 = arith.constant 0 : index
    %c0_14 = arith.constant 0 : index
    %43 = vector.load %arg3[%c0_13, %c0_14] : memref<2x1024xf32, #tpu.memory_space<vmem>>, vector<2x1024xf32>
    tpu.vector_store %arg3[%c0_13, %c0_14], %42 {strides = array<i32>} : memref<2x1024xf32, #tpu.memory_space<vmem>>, vector<2x1024xf32>,
    return
  }
  func.func @transform_0(%arg0: i32) -> i32 {
    %c0_i32 = arith.constant 0 : i32
    %c0_i32_0 = arith.constant 0 : i32
    return %c0_i32 : i32
  }
  func.func @transform_1(%arg0: i32) -> (i32, i32) {
    %c0_i32 = arith.constant 0 : i32
    %c0_i32_0 = arith.constant 0 : i32
    return %arg0, %c0_i32 : i32, i32
  }
  func.func @transform_2(%arg0: i32) -> (i32, i32) {
    %c0_i32 = arith.constant 0 : i32
    %c0_i32_0 = arith.constant 0 : i32
    return %arg0, %c0_i32 : i32, i32
  }
}

</mosaic_0001>

<bundles_post_ra>
// kernel: tpu_custom_call.1
= control target key start
LH: loop header
LB: loop body
LE: loop exit
PB: predicated region body
PF: predicated region fallthrough
CT: control target
= control target key end

     0   :  { %7 = vsyncpa [#allocation5], 0  ;;  %s214_s0 = inlined_call_operand.hbm [shape: f32[2], index: 0, kind: input, shape index: {}]   ;;  %s215_s1 = inlined_call_operand.hbm [shape: f32[2,1024], index: 1, kind: input, shape index: {}]   ;;  %s216_s2 = inlined_call_operand.hbm [shape: f32[2,1024], index: 2, kind: output, shape index: {}]  }
   0x1   :  { %8 = vsyncpa [#allocation3], 0 }
   0x2   :  { %9 = vsyncpa [#allocation4], 0  ;;  %s15_s11 = sshll.u32 %s214_s0, 4  ;;  %s24_s14 = sshll.u32 %s215_s1, 4  ;;  %s16_s11 = int_to_ptr.hbm [resolvable:$true] %s15_s11  ;;  %s25_s14 = int_to_ptr.hbm [resolvable:$true] %s24_s14 }
   0x3   :  { %s187_s15 = smov [#allocation2]   ;;  %s188_s16 = smov [#allocation6]  }
   0x4   :  { %18 = dma.hbm_to_smem %s16_s11, 16, %s187_s15, [#allocation5]  }
   0x5   :  { %s26_s17 = sshll.u32 %s188_s16, 4  ;;  %s27_s17 = int_to_ptr.vmem [resolvable:$true] %s26_s17 }
   0x6   :  { %29 = dma.hbm_to_vmem [thread:$0]  %s25_s14, 256, %s27_s17, [#allocation3]  }
   0x7   :  { %181 = dma.done.wait [#allocation5], 16  }
   0x8   :  { %182 = vsyncadd [#allocation5], 4294967280 }
   0x9   :  { %183 = dma.done.wait [#allocation3], 256  }
   0xa   :  { %184 = vsyncadd [#allocation3], 4294967040 }
   0xb   :  { %38 = sfence }
   0xc   :  { %s39_s18 = sld [smem:[#allocation2]]  ;;  %v41_v0 = vld [vmem:[#allocation6] sm:$0xff]  ;;  %v42_v1 = vld [vmem:[#allocation6 + $0x8] sm:$0xff]  ;;  %s189_s1 = smov [#allocation7]  }
   0xd   :  { %s115_s0 = sld [smem:[#allocation2 + $0x1]]  ;;  %s102_s19 = sshll.u32 %s189_s1, 4  ;;  %s103_s19 = int_to_ptr.vmem [resolvable:$true] %s102_s19 }
   0xe   :  { %s104_s22 = sshll.u32 %s216_s2, 4  ;;  %s105_s22 = int_to_ptr.hbm [resolvable:$true] %s104_s22 }
  0x12   :  { %v43_v2 = vstv %s39_s18 }
  0x13   :  { %v44_v3 = vsub.f32 %v41_v0, %v43_v2  ;;  %v45_v4 = vsub.f32 %v42_v1, %v43_v2  ;;  %v90_v47 = vstv %s115_s0 }
  0x15   :  { %v46_v5 = vmul.f32 0.31830987, %v44_v3  ;;  %v47_v6 = vmul.f32 0.31830987, %v45_v4 }
  0x17   :  { %v48_v7 = vfloor.f32 %v46_v5  ;;  %v49_v8 = vfloor.f32 %v47_v6 }
  0x19   :  { %v50_v9 = vmul.f32 3.140625, %v48_v7  ;;  %v54_v10 = vmul.f32 0.0009676536, %v48_v7  ;;  %v51_v11 = vmul.f32 3.140625, %v49_v8  ;;  %v55_v12 = vmul.f32 0.0009676536, %v49_v8 }
  0x1b   :  { %v52_v13 = vsub.f32 %v44_v3, %v50_v9  ;;  %v53_v14 = vsub.f32 %v45_v4, %v51_v11 }
  0x1d   :  { %v56_v15 = vsub.f32 %v52_v13, %v54_v10  ;;  %v57_v16 = vsub.f32 %v53_v14, %v55_v12 }
  0x1f   :  { %v116_v17 = vadd.f32 -1.5707964, %v56_v15  ;;  %v117_v18 = vadd.f32 -1.5707964, %v57_v16 }
  0x21   :  { %v60_v19 = vand.u32 2147483647, %v116_v17  ;;  %v61_v20 = vand.u32 2147483647, %v117_v18 }
  0x23   :  { %v62_v21 = vsub.f32 1.5707964, %v60_v19  ;;  %v63_v22 = vsub.f32 1.5707964, %v61_v20 }
  0x25   :  { %v64_v23 = vmul.f32 %v62_v21, %v62_v21  ;;  %v65_v24 = vmul.f32 %v63_v22, %v63_v22 }
  0x27   :  { %v66_v25 = vmul.f32 2.0876756e-09, %v64_v23  ;;  %v67_v26 = vmul.f32 2.0876756e-09, %v65_v24 }
  0x29   :  { %v68_v27 = vadd.f32 -2.755732e-07, %v66_v25  ;;  %v69_v28 = vadd.f32 -2.755732e-07, %v67_v26 }
  0x2b   :  { %v70_v29 = vmul.f32 %v68_v27, %v64_v23  ;;  %v71_v30 = vmul.f32 %v69_v28, %v65_v24 }
  0x2d   :  { %v72_v31 = vadd.f32 2.4801588e-05, %v70_v29  ;;  %v73_v32 = vadd.f32 2.4801588e-05, %v71_v30 }
  0x2f   :  { %v74_v33 = vmul.f32 %v72_v31, %v64_v23  ;;  %v75_v34 = vmul.f32 %v73_v32, %v65_v24 }
  0x31   :  { %v76_v35 = vadd.f32 -0.0013888889, %v74_v33  ;;  %v77_v36 = vadd.f32 -0.0013888889, %v75_v34 }
  0x33   :  { %v78_v37 = vmul.f32 %v76_v35, %v64_v23  ;;  %v79_v38 = vmul.f32 %v77_v36, %v65_v24 }
  0x35   :  { %v80_v39 = vadd.f32 0.041666668, %v78_v37  ;;  %v81_v40 = vadd.f32 0.041666668, %v79_v38 }
  0x37   :  { %v82_v41 = vmul.f32 %v80_v39, %v64_v23  ;;  %v83_v42 = vmul.f32 %v81_v40, %v65_v24 }
  0x39   :  { %v84_v43 = vadd.f32 -0.5, %v82_v41  ;;  %v85_v44 = vadd.f32 -0.5, %v83_v42 }
  0x3b   :  { %v86_v45 = vmul.f32 %v84_v43, %v64_v23  ;;  %v87_v46 = vmul.f32 %v85_v44, %v65_v24 }
  0x3d   :  { %v88_v48 = vadd.f32 1.0, %v86_v45  ;;  %v89_v49 = vadd.f32 1.0, %v87_v46 }
  0x3f   :  { %v91_v50 = vmul.f32 %v90_v47, %v88_v48  ;;  %v92_v51 = vmul.f32 %v90_v47, %v89_v49 }
  0x41   :  { %v93_v52 = vsub.f32 %v91_v50, %v90_v47  ;;  %v94_v53 = vsub.f32 %v92_v51, %v90_v47 }
  0x43   :  { %95 = vst [vmem:[#allocation7] sm:$0xff] %v93_v52 }
  0x44   :  { %96 = vst [vmem:[#allocation7 + $0x8] sm:$0xff] %v94_v53 }
  0x45   :  { %107 = dma.vmem_to_hbm [thread:$0]  %s103_s19, 256, %s105_s22, [#allocation4]  }
  0x46   :  { %185 = dma.done.wait [#allocation4], 256  }
  0x47   :  { %186 = vsyncadd [#allocation4], 4294967040 }
  0x48   :  { %112 = vsyncpa [#allocation3], 1 }
  0x49   :  { %113 = vsyncpa [#allocation4], 1 }
  0x4a   :  { %114 = vsyncpa [#allocation5], 1 }

</bundles_post_ra>
